<compile_context>
chip_gen: v7x
topology: tpu7x:2x2x1
jax: 0.10.0
libtpu: 0.0.40
codegen_flags: <defaults>
</compile_context>

<pallas_src>
import functools

import numpy as np
import jax
import jax.numpy as jnp
from jax.experimental import pallas as pl
from jax.experimental.pallas import tpu as pltpu

LN_EPS = 1e-5  # nn.LayerNorm default


def _stem_kernel(x_ref, mask_ref, params_ref, pv_ref, out_ref, *,
                 block_n, recurrent):
    # x_ref:      (1, C, L)          input / output tile for this batch element
    # mask_ref:   (1, 1, L)          0/1 validity mask (f32)
    # params_ref: (block_n, C, 2)    [:, :, 0] = scale*gamma, [:, :, 1] = scale*beta
    # pv_ref:     (1, L)             column-mean of the adaptive-avg-pool matrix
    m = mask_ref[0]                       # (1, L)
    pv = pv_ref[...]                      # (1, L)
    x = x_ref[0].astype(jnp.float32)      # (C, L), compute in f32 on all chips

    for blk in range(block_n):            # block_n is a small static int
        res = x                           # residual fixed per block
        p = params_ref[blk]               # (C, 2)
        gamma = p[:, 0:1]                 # (C, 1)  AffineDropPath scale folded in
        beta = p[:, 1:2]                  # (C, 1)

        def body(_, xc, gamma=gamma, beta=beta, res=res):
            # ---- channel branch: adaptive_pool -> avg_pool(O) -> sigmoid ----
            # collapsed to a weighted row-sum (exact column-mean of pool matrix).
            # Gate is computed from the raw (unmasked) x, matching the reference.
            # TODO(synk): if VPU/XLU-bound at production sizes, this reduction
            # could move to the (idle) MXU via dot(xc, pv.T) with HIGHEST precision.
            gate = jax.nn.sigmoid(
                jnp.sum(xc * pv, axis=1, keepdims=True))               # (C, 1)

            # ---- temporal branch: LayerNorm over channels (per position) ----
            mu = jnp.mean(xc, axis=0, keepdims=True)                   # (1, L)
            d = xc - mu
            var = jnp.mean(d * d, axis=0, keepdims=True)               # (1, L)
            inv = jax.lax.rsqrt(var + LN_EPS)                          # EUP
            # TODO(synk): FABS6 (t_mamba / c_mamba) source not provided; both
            # are treated as identity here.

            # Fold the per-channel gate into the (already scale-folded) affine:
            #   (xn*gamma + beta) * gate == xn*(gamma*gate) + beta*gate
            g2 = gamma * gate                                          # (C, 1)
            b2 = beta * gate                                           # (C, 1)
            # nearest-interp from length 1 == broadcast; 0/1 mask applied once
            # (reference masks both branches, but mask^2 == mask).
            y = (d * inv * g2 + b2) * m
            return y + res

        x = jax.lax.fori_loop(0, recurrent, body, x, unroll=True)

    out_ref[0] = x.astype(out_ref.dtype)


def stem_forward(x, mask_f, params, pool_vec, *, block_n, recurrent):
    B, C, L = x.shape
    kernel = functools.partial(_stem_kernel, block_n=block_n,
                               recurrent=recurrent)
    # TODO(synk): for v7x with tiny B, a second "parallel" grid axis would keep
    # both TensorCores busy, but it would require a two-pass (or precomputed)
    # channel gate / LayerNorm since both reduce over a full axis.
    return pl.pallas_call(
        kernel,
        out_shape=jax.ShapeDtypeStruct((B, C, L), x.dtype),
        grid_spec=pltpu.PrefetchScalarGridSpec(
            num_scalar_prefetch=0,
            grid=(B,),
            in_specs=[
                pl.BlockSpec((1, C, L), lambda b: (b, 0, 0)),        # x
                pl.BlockSpec((1, 1, L), lambda b: (b, 0, 0)),        # mask
                pl.BlockSpec((block_n, C, 2), lambda b: (0, 0, 0)),  # ln affine (scale folded)
                pl.BlockSpec((1, L), lambda b: (0, 0)),              # pool weight vector
            ],
            out_specs=pl.BlockSpec((1, C, L), lambda b: (b, 0, 0)),
        ),
        input_output_aliases={0: 0},   # output may reuse x's HBM buffer
        compiler_params=pltpu.CompilerParams(
            dimension_semantics=("parallel",),
            vmem_limit_bytes=48 * 1024 * 1024),
    )(x, mask_f, params, pool_vec)


def _adaptive_pool_mean_vec(L, O):
    """(1, L) vector v s.t. sum(x * v, -1) == mean over O of AdaptiveAvgPool1d(O)(x)."""
    vec = np.zeros((L,), np.float64)
    for j in range(O):
        start = (j * L) // O
        end = -((-(j + 1) * L) // O)   # ceil((j+1)*L/O)
        vec[start:end] += 1.0 / (end - start)
    vec /= O
    return vec.reshape(1, L).astype(np.float32)


class StemModulePallas:
    """Eval-mode forward of StemModule (FABS6 branches stubbed as identity)."""

    def __init__(self, block_n, emb_c, kernel_size, drop_path_rate, recurrent,
                 pool_size=2304 // 4):
        del kernel_size, drop_path_rate  # kernel_size only used by FABS6; drop is eval no-op
        self.block_n = block_n
        self.emb_c = emb_c
        self.recurrent = recurrent
        self.pool_size = pool_size
        # nn.LayerNorm defaults (gamma=1, beta=0) with AffineDropPath scale (1e-4)
        # folded in on the host:  scale*(g*xn + b) == (scale*g)*xn + (scale*b)
        gamma = np.ones((block_n, emb_c), np.float32)
        beta = np.zeros((block_n, emb_c), np.float32)
        scale = np.full((block_n, emb_c), 1e-4, np.float32)
        self.params = jnp.asarray(
            np.stack([scale * gamma, scale * beta], axis=-1))  # (block_n, C, 2)
        self._pool_vec_cache = {}

    def _pool_vec(self, L):
        key = int(L)
        if key not in self._pool_vec_cache:
            self._pool_vec_cache[key] = jnp.asarray(
                _adaptive_pool_mean_vec(L, self.pool_size))
        return self._pool_vec_cache[key]

    def __call__(self, x, mask):
        B, C, L = x.shape
        mask_f = mask.astype(jnp.float32).reshape(B, 1, L)
        pool_vec = self._pool_vec(L)
        out = stem_forward(x, mask_f, self.params, pool_vec,
                           block_n=self.block_n, recurrent=self.recurrent)
        return out, mask


# ----------------------------------------------------------------------------
# Pure-JAX reference (un-collapsed channel branch, un-folded scale/gate, mask
# applied twice) used only to validate the algebraic simplifications.
# ----------------------------------------------------------------------------
def _reference_forward(x, mask, block_n, recurrent, pool_size):
    B, C, L = x.shape
    m = mask.astype(x.dtype).reshape(B, 1, L)
    gamma = jnp.ones((C,), x.dtype)
    beta = jnp.zeros((C,), x.dtype)
    scale = 1e-4
    M = np.zeros((L, pool_size), np.float32)
    for j in range(pool_size):
        s = (j * L) // pool_size
        e = -((-(j + 1) * L) // pool_size)
        M[s:e, j] = 1.0 / (e - s)
    M = jnp.asarray(M, x.dtype)
    for _ in range(block_n):
        res = x
        for _ in range(recurrent):
            mu = jnp.mean(x, axis=1, keepdims=True)
            var = jnp.mean((x - mu) ** 2, axis=1, keepdims=True)
            xn = (x - mu) / jnp.sqrt(var + LN_EPS)
            x_t = xn * gamma[None, :, None] + beta[None, :, None]
            x_t = x_t * m
            x_c = jnp.einsum('bcl,lo->bco', x, M)            # adaptive pool
            g = jax.nn.sigmoid(jnp.mean(x_c, axis=2, keepdims=True))
            x_c_full = jnp.broadcast_to(g, x.shape) * m      # nearest interp
            x = scale * (x_t * x_c_full) + res               # AffineDropPath + residual
    return x


if __name__ == "__main__":
    key = jax.random.PRNGKey(0)
    B, C, L = 2, 8, 16
    x = jax.random.normal(key, (B, C, L), dtype=jnp.float32)
    # boolean validity mask, shape (B, 1, L); second sample has a padded tail
    valid_len = jnp.array([L, 12])
    mask = (jnp.arange(L)[None, None, :] < valid_len[:, None, None])

    ref = _reference_forward(x, mask, block_n=2, recurrent=2,
                             pool_size=2304 // 4)

    model = StemModulePallas(block_n=2, emb_c=C, kernel_size=3,
                             drop_path_rate=0.0, recurrent=2)
    out_x, out_mask = model(x, mask)
    jax.block_until_ready(out_x)

    assert out_x.shape == (B, C, L) and out_x.dtype == jnp.float32
    assert bool(jnp.all(jnp.isfinite(out_x)))
    np.testing.assert_allclose(np.asarray(out_x), np.asarray(ref),
                               rtol=1e-4, atol=1e-5)
    print("KERNEL_OK")
</pallas_src>

<mosaic_0001>
module attributes {stable_mosaic.version = 11 : i64} {
  func.func @_stem_kernel(%arg0: i32, %arg1: memref<1x8x16xf32, #tpu.memory_space<vmem>>, %arg2: memref<1x1x16xf32, #tpu.memory_space<vmem>>, %arg3: memref<2x8x2xf32, #tpu.memory_space<vmem>>, %arg4: memref<1x16xf32, #tpu.memory_space<vmem>>, %arg5: memref<1x8x16xf32, #tpu.memory_space<vmem>>) attributes {dimension_semantics = [#tpu.dimension_semantics<parallel>], iteration_bounds = array<i64: 2>, scalar_prefetch = 0 : i64, scratch_operands = 0 : i64, tpu.core_type = #tpu.core_type<tc>, window_params = [{transform_indices = @transform_0, window_bounds = array<i64: 1, 8, 16>}, {transform_indices = @transform_1, window_bounds = array<i64: 1, 1, 16>}, {pipeline_mode = #tpu.pipeline_mode<synchronous>, transform_indices = @transform_2, window_bounds = array<i64: 2, 8, 2>}, {pipeline_mode = #tpu.pipeline_mode<synchronous>, transform_indices = @transform_3, window_bounds = array<i64: 1, 16>}, {transform_indices = @transform_4, window_bounds = array<i64: 1, 8, 16>}]} {
    %c0 = arith.constant 0 : index
    %c0_0 = arith.constant 0 : index
    %c0_1 = arith.constant 0 : index
    %0 = vector.load %arg2[%c0, %c0_0, %c0_1] : memref<1x1x16xf32, #tpu.memory_space<vmem>>, vector<1x1x16xf32>
    %1 = vector.shape_cast %0 : vector<1x1x16xf32> to vector<1x16xf32>
    %c0_2 = arith.constant 0 : index
    %c0_3 = arith.constant 0 : index
    %2 = vector.load %arg4[%c0_2, %c0_3] : memref<1x16xf32, #tpu.memory_space<vmem>>, vector<1x16xf32>
    %c0_4 = arith.constant 0 : index
    %c0_5 = arith.constant 0 : index
    %c0_6 = arith.constant 0 : index
    %3 = vector.load %arg1[%c0_4, %c0_5, %c0_6] : memref<1x8x16xf32, #tpu.memory_space<vmem>>, vector<1x8x16xf32>
    %4 = vector.shape_cast %3 : vector<1x8x16xf32> to vector<8x16xf32>
    %c0_7 = arith.constant 0 : index
    %c0_8 = arith.constant 0 : index
    %c0_9 = arith.constant 0 : index
    %5 = vector.load %arg3[%c0_7, %c0_8, %c0_9] : memref<2x8x2xf32, #tpu.memory_space<vmem>>, vector<1x8x2xf32>
    %6 = vector.shape_cast %5 : vector<1x8x2xf32> to vector<8x2xf32>
    %7 = vector.extract_strided_slice %6 {offsets = [0, 0], sizes = [8, 1], strides = [1, 1]} : vector<8x2xf32> to vector<8x1xf32>
    %8 = vector.extract_strided_slice %6 {offsets = [0, 1], sizes = [8, 1], strides = [1, 1]} : vector<8x2xf32> to vector<8x1xf32>
    %c0_i32 = arith.constant 0 : i32
    %9 = vector.broadcast %2 : vector<1x16xf32> to vector<8x16xf32>
    %10 = arith.mulf %4, %9 : vector<8x16xf32>
    %cst = arith.constant dense<0.000000e+00> : vector<8xf32>
    %11 = vector.multi_reduction <add>, %10, %cst [1] : vector<8x16xf32> to vector<8xf32>
    %12 = vector.shape_cast %11 : vector<8xf32> to vector<8x1xf32>
    %13 = arith.negf %12 : vector<8x1xf32>
    %14 = math.exp %13 : vector<8x1xf32>
    %cst_10 = arith.constant 1.000000e+00 : f32
    %15 = vector.broadcast %cst_10 : f32 to vector<8x1xf32>
    %16 = arith.addf %15, %14 : vector<8x1xf32>
    %17 = arith.divf %15, %16 : vector<8x1xf32>
    %cst_11 = arith.constant dense<0.000000e+00> : vector<16xf32>
    %18 = vector.multi_reduction <add>, %4, %cst_11 [0] : vector<8x16xf32> to vector<16xf32>
    %19 = vector.shape_cast %18 : vector<16xf32> to vector<1x16xf32>
    %cst_12 = arith.constant 8.000000e+00 : f32
    %20 = vector.broadcast %cst_12 : f32 to vector<1x16xf32>
    %21 = arith.divf %19, %20 : vector<1x16xf32>
    %22 = vector.broadcast %21 : vector<1x16xf32> to vector<8x16xf32>
    %23 = arith.subf %4, %22 : vector<8x16xf32>
    %24 = arith.mulf %23, %23 : vector<8x16xf32>
    %cst_13 = arith.constant dense<0.000000e+00> : vector<16xf32>
    %25 = vector.multi_reduction <add>, %24, %cst_13 [0] : vector<8x16xf32> to vector<16xf32>
    %26 = vector.shape_cast %25 : vector<16xf32> to vector<1x16xf32>
    %cst_14 = arith.constant 8.000000e+00 : f32
    %27 = vector.broadcast %cst_14 : f32 to vector<1x16xf32>
    %28 = arith.divf %26, %27 : vector<1x16xf32>
    %cst_15 = arith.constant 9.99999974E-6 : f32
    %29 = vector.broadcast %cst_15 : f32 to vector<1x16xf32>
    %30 = arith.addf %28, %29 : vector<1x16xf32>
    %31 = math.rsqrt %30 : vector<1x16xf32>
    %32 = arith.mulf %7, %17 : vector<8x1xf32>
    %33 = arith.mulf %8, %17 : vector<8x1xf32>
    %34 = vector.broadcast %31 : vector<1x16xf32> to vector<8x16xf32>
    %35 = arith.mulf %23, %34 : vector<8x16xf32>
    %36 = vector.broadcast %32 : vector<8x1xf32> to vector<8x16xf32>
    %37 = arith.mulf %35, %36 : vector<8x16xf32>
    %38 = vector.broadcast %33 : vector<8x1xf32> to vector<8x16xf32>
    %39 = arith.addf %37, %38 : vector<8x16xf32>
    %40 = vector.broadcast %1 : vector<1x16xf32> to vector<8x16xf32>
    %41 = arith.mulf %39, %40 : vector<8x16xf32>
    %42 = arith.addf %41, %4 : vector<8x16xf32>
    %c1_i32 = arith.constant 1 : i32
    %43 = vector.broadcast %2 : vector<1x16xf32> to vector<8x16xf32>
    %44 = arith.mulf %42, %43 : vector<8x16xf32>
    %cst_16 = arith.constant dense<0.000000e+00> : vector<8xf32>
    %45 = vector.multi_reduction <add>, %44, %cst_16 [1] : vector<8x16xf32> to vector<8xf32>
    %46 = vector.shape_cast %45 : vector<8xf32> to vector<8x1xf32>
    %47 = arith.negf %46 : vector<8x1xf32>
    %48 = math.exp %47 : vector<8x1xf32>
    %cst_17 = arith.constant 1.000000e+00 : f32
    %49 = vector.broadcast %cst_17 : f32 to vector<8x1xf32>
    %50 = arith.addf %49, %48 : vector<8x1xf32>
    %51 = arith.divf %49, %50 : vector<8x1xf32>
    %cst_18 = arith.constant dense<0.000000e+00> : vector<16xf32>
    %52 = vector.multi_reduction <add>, %42, %cst_18 [0] : vector<8x16xf32> to vector<16xf32>
    %53 = vector.shape_cast %52 : vector<16xf32> to vector<1x16xf32>
    %cst_19 = arith.constant 8.000000e+00 : f32
    %54 = vector.broadcast %cst_19 : f32 to vector<1x16xf32>
    %55 = arith.divf %53, %54 : vector<1x16xf32>
    %56 = vector.broadcast %55 : vector<1x16xf32> to vector<8x16xf32>
    %57 = arith.subf %42, %56 : vector<8x16xf32>
    %58 = arith.mulf %57, %57 : vector<8x16xf32>
    %cst_20 = arith.constant dense<0.000000e+00> : vector<16xf32>
    %59 = vector.multi_reduction <add>, %58, %cst_20 [0] : vector<8x16xf32> to vector<16xf32>
    %60 = vector.shape_cast %59 : vector<16xf32> to vector<1x16xf32>
    %cst_21 = arith.constant 8.000000e+00 : f32
    %61 = vector.broadcast %cst_21 : f32 to vector<1x16xf32>
    %62 = arith.divf %60, %61 : vector<1x16xf32>
    %cst_22 = arith.constant 9.99999974E-6 : f32
    %63 = vector.broadcast %cst_22 : f32 to vector<1x16xf32>
    %64 = arith.addf %62, %63 : vector<1x16xf32>
    %65 = math.rsqrt %64 : vector<1x16xf32>
    %66 = arith.mulf %7, %51 : vector<8x1xf32>
    %67 = arith.mulf %8, %51 : vector<8x1xf32>
    %68 = vector.broadcast %65 : vector<1x16xf32> to vector<8x16xf32>
    %69 = arith.mulf %57, %68 : vector<8x16xf32>
    %70 = vector.broadcast %66 : vector<8x1xf32> to vector<8x16xf32>
    %71 = arith.mulf %69, %70 : vector<8x16xf32>
    %72 = vector.broadcast %67 : vector<8x1xf32> to vector<8x16xf32>
    %73 = arith.addf %71, %72 : vector<8x16xf32>
    %74 = vector.broadcast %1 : vector<1x16xf32> to vector<8x16xf32>
    %75 = arith.mulf %73, %74 : vector<8x16xf32>
    %76 = arith.addf %75, %4 : vector<8x16xf32>
    %c1 = arith.constant 1 : index
    %c0_23 = arith.constant 0 : index
    %c0_24 = arith.constant 0 : index
    %77 = vector.load %arg3[%c1, %c0_23, %c0_24] : memref<2x8x2xf32, #tpu.memory_space<vmem>>, vector<1x8x2xf32>
    %78 = vector.shape_cast %77 : vector<1x8x2xf32> to vector<8x2xf32>
    %79 = vector.extract_strided_slice %78 {offsets = [0, 0], sizes = [8, 1], strides = [1, 1]} : vector<8x2xf32> to vector<8x1xf32>
    %80 = vector.extract_strided_slice %78 {offsets = [0, 1], sizes = [8, 1], strides = [1, 1]} : vector<8x2xf32> to vector<8x1xf32>
    %c0_i32_25 = arith.constant 0 : i32
    %81 = vector.broadcast %2 : vector<1x16xf32> to vector<8x16xf32>
    %82 = arith.mulf %76, %81 : vector<8x16xf32>
    %cst_26 = arith.constant dense<0.000000e+00> : vector<8xf32>
    %83 = vector.multi_reduction <add>, %82, %cst_26 [1] : vector<8x16xf32> to vector<8xf32>
    %84 = vector.shape_cast %83 : vector<8xf32> to vector<8x1xf32>
    %85 = arith.negf %84 : vector<8x1xf32>
    %86 = math.exp %85 : vector<8x1xf32>
    %cst_27 = arith.constant 1.000000e+00 : f32
    %87 = vector.broadcast %cst_27 : f32 to vector<8x1xf32>
    %88 = arith.addf %87, %86 : vector<8x1xf32>
    %89 = arith.divf %87, %88 : vector<8x1xf32>
    %cst_28 = arith.constant dense<0.000000e+00> : vector<16xf32>
    %90 = vector.multi_reduction <add>, %76, %cst_28 [0] : vector<8x16xf32> to vector<16xf32>
    %91 = vector.shape_cast %90 : vector<16xf32> to vector<1x16xf32>
    %cst_29 = arith.constant 8.000000e+00 : f32
    %92 = vector.broadcast %cst_29 : f32 to vector<1x16xf32>
    %93 = arith.divf %91, %92 : vector<1x16xf32>
    %94 = vector.broadcast %93 : vector<1x16xf32> to vector<8x16xf32>
    %95 = arith.subf %76, %94 : vector<8x16xf32>
    %96 = arith.mulf %95, %95 : vector<8x16xf32>
    %cst_30 = arith.constant dense<0.000000e+00> : vector<16xf32>
    %97 = vector.multi_reduction <add>, %96, %cst_30 [0] : vector<8x16xf32> to vector<16xf32>
    %98 = vector.shape_cast %97 : vector<16xf32> to vector<1x16xf32>
    %cst_31 = arith.constant 8.000000e+00 : f32
    %99 = vector.broadcast %cst_31 : f32 to vector<1x16xf32>
    %100 = arith.divf %98, %99 : vector<1x16xf32>
    %cst_32 = arith.constant 9.99999974E-6 : f32
    %101 = vector.broadcast %cst_32 : f32 to vector<1x16xf32>
    %102 = arith.addf %100, %101 : vector<1x16xf32>
    %103 = math.rsqrt %102 : vector<1x16xf32>
    %104 = arith.mulf %79, %89 : vector<8x1xf32>
    %105 = arith.mulf %80, %89 : vector<8x1xf32>
    %106 = vector.broadcast %103 : vector<1x16xf32> to vector<8x16xf32>
    %107 = arith.mulf %95, %106 : vector<8x16xf32>
    %108 = vector.broadcast %104 : vector<8x1xf32> to vector<8x16xf32>
    %109 = arith.mulf %107, %108 : vector<8x16xf32>
    %110 = vector.broadcast %105 : vector<8x1xf32> to vector<8x16xf32>
    %111 = arith.addf %109, %110 : vector<8x16xf32>
    %112 = vector.broadcast %1 : vector<1x16xf32> to vector<8x16xf32>
    %113 = arith.mulf %111, %112 : vector<8x16xf32>
    %114 = arith.addf %113, %76 : vector<8x16xf32>
    %c1_i32_33 = arith.constant 1 : i32
    %115 = vector.broadcast %2 : vector<1x16xf32> to vector<8x16xf32>
    %116 = arith.mulf %114, %115 : vector<8x16xf32>
    %cst_34 = arith.constant dense<0.000000e+00> : vector<8xf32>
    %117 = vector.multi_reduction <add>, %116, %cst_34 [1] : vector<8x16xf32> to vector<8xf32>
    %118 = vector.shape_cast %117 : vector<8xf32> to vector<8x1xf32>
    %119 = arith.negf %118 : vector<8x1xf32>
    %120 = math.exp %119 : vector<8x1xf32>
    %cst_35 = arith.constant 1.000000e+00 : f32
    %121 = vector.broadcast %cst_35 : f32 to vector<8x1xf32>
    %122 = arith.addf %121, %120 : vector<8x1xf32>
    %123 = arith.divf %121, %122 : vector<8x1xf32>
    %cst_36 = arith.constant dense<0.000000e+00> : vector<16xf32>
    %124 = vector.multi_reduction <add>, %114, %cst_36 [0] : vector<8x16xf32> to vector<16xf32>
    %125 = vector.shape_cast %124 : vector<16xf32> to vector<1x16xf32>
    %cst_37 = arith.constant 8.000000e+00 : f32
    %126 = vector.broadcast %cst_37 : f32 to vector<1x16xf32>
    %127 = arith.divf %125, %126 : vector<1x16xf32>
    %128 = vector.broadcast %127 : vector<1x16xf32> to vector<8x16xf32>
    %129 = arith.subf %114, %128 : vector<8x16xf32>
    %130 = arith.mulf %129, %129 : vector<8x16xf32>
    %cst_38 = arith.constant dense<0.000000e+00> : vector<16xf32>
    %131 = vector.multi_reduction <add>, %130, %cst_38 [0] : vector<8x16xf32> to vector<16xf32>
    %132 = vector.shape_cast %131 : vector<16xf32> to vector<1x16xf32>
    %cst_39 = arith.constant 8.000000e+00 : f32
    %133 = vector.broadcast %cst_39 : f32 to vector<1x16xf32>
    %134 = arith.divf %132, %133 : vector<1x16xf32>
    %cst_40 = arith.constant 9.99999974E-6 : f32
    %135 = vector.broadcast %cst_40 : f32 to vector<1x16xf32>
    %136 = arith.addf %134, %135 : vector<1x16xf32>
    %137 = math.rsqrt %136 : vector<1x16xf32>
    %138 = arith.mulf %79, %123 : vector<8x1xf32>
    %139 = arith.mulf %80, %123 : vector<8x1xf32>
    %140 = vector.broadcast %137 : vector<1x16xf32> to vector<8x16xf32>
    %141 = arith.mulf %129, %140 : vector<8x16xf32>
    %142 = vector.broadcast %138 : vector<8x1xf32> to vector<8x16xf32>
    %143 = arith.mulf %141, %142 : vector<8x16xf32>
    %144 = vector.broadcast %139 : vector<8x1xf32> to vector<8x16xf32>
    %145 = arith.addf %143, %144 : vector<8x16xf32>
    %146 = vector.broadcast %1 : vector<1x16xf32> to vector<8x16xf32>
    %147 = arith.mulf %145, %146 : vector<8x16xf32>
    %148 = arith.addf %147, %76 : vector<8x16xf32>
    %c0_41 = arith.constant 0 : index
    %c0_42 = arith.constant 0 : index
    %c0_43 = arith.constant 0 : index
    %149 = vector.load %arg5[%c0_41, %c0_42, %c0_43] : memref<1x8x16xf32, #tpu.memory_space<vmem>>, vector<1x8x16xf32>
    %150 = vector.shape_cast %149 : vector<1x8x16xf32> to vector<8x16xf32>
    %151 = vector.shape_cast %148 : vector<8x16xf32> to vector<1x8x16xf32>
    tpu.vector_store %arg5[%c0_41, %c0_42, %c0_43], %151 {strides = array<i32>} : memref<1x8x16xf32, #tpu.memory_space<vmem>>, vector<1x8x16xf32>,
    return
  }
  func.func @transform_0(%arg0: i32) -> (i32, i32, i32) {
    %c0_i32 = arith.constant 0 : i32
    %c0_i32_0 = arith.constant 0 : i32
    %c0_i32_1 = arith.constant 0 : i32
    return %arg0, %c0_i32, %c0_i32_0 : i32, i32, i32
  }
  func.func @transform_1(%arg0: i32) -> (i32, i32, i32) {
    %c0_i32 = arith.constant 0 : i32
    %c0_i32_0 = arith.constant 0 : i32
    %c0_i32_1 = arith.constant 0 : i32
    return %arg0, %c0_i32, %c0_i32_0 : i32, i32, i32
  }
  func.func @transform_2(%arg0: i32) -> (i32, i32, i32) {
    %c0_i32 = arith.constant 0 : i32
    %c0_i32_0 = arith.constant 0 : i32
    %c0_i32_1 = arith.constant 0 : i32
    %c0_i32_2 = arith.constant 0 : i32
    return %c0_i32, %c0_i32_0, %c0_i32_1 : i32, i32, i32
  }
  func.func @transform_3(%arg0: i32) -> (i32, i32) {
    %c0_i32 = arith.constant 0 : i32
    %c0_i32_0 = arith.constant 0 : i32
    %c0_i32_1 = arith.constant 0 : i32
    return %c0_i32, %c0_i32_0 : i32, i32
  }
  func.func @transform_4(%arg0: i32) -> (i32, i32, i32) {
    %c0_i32 = arith.constant 0 : i32
    %c0_i32_0 = arith.constant 0 : i32
    %c0_i32_1 = arith.constant 0 : i32
    return %arg0, %c0_i32, %c0_i32_0 : i32, i32, i32
  }
}

</mosaic_0001>

<bundles_post_ra>
// kernel: tpu_custom_call.1
= control target key start
LH: loop header
LB: loop body
LE: loop exit
PB: predicated region body
PF: predicated region fallthrough
CT: control target
= control target key end

     0   :  { %9 = vsyncpa [#allocation3], 0  ;;  %s968_s0 = inlined_call_operand.hbm [shape: f32[2,8,16], index: 0, kind: input, shape index: {}, may-alias: {0,4}]   ;;  %s969_s1 = inlined_call_operand.vmem [shape: f32[2,1,16], index: 1, kind: input, shape index: {}]   ;;  %s970_s2 = inlined_call_operand.vmem [shape: f32[2,8,2], index: 2, kind: input, shape index: {}]   ;;  %s971_s3 = inlined_call_operand.vmem [shape: f32[1,16], index: 3, kind: input, shape index: {}]   ;;  %s972_s4 = inlined_call_operand.hbm [shape: f32[2,8,16], index: 4, kind: output, shape index: {}, may-alias: {0,4}]  }
   0x1   :  { %11 = vsyncpa [#allocation3 + $0x1], 0 }
   0x2   :  { %12 = vsyncpa [#allocation4], 0 }
   0x3   :  { %14 = vsyncpa [#allocation4 + $0x1], 0  ;;  %s746_s15 = smov 0   ;;  %s748_s16 = smov 0  }
   0x4   :  { %s750_s17 = smov 0   ;;  %s752_s18 = smov 0  }
   0x5 LB: > { %s767_s19 = sadd.s32 4294967295, %s715_s18   ;;  %s521_s20 = sadd.s32 4294967294, %s715_s18   ;;  %s715_s18 = sphi %s752_s18, %s987_s18   ;;  %s711_s17 = sphi %s750_s17, %s986_s17   ;;  %s707_s16 = sphi %s748_s16, %s985_s16   ;;  %s703_s15 = sphi %s746_s15, %s984_s15  }
   0x6   : > { %s771_s21 = sadd.s32 1, %s715_s18   ;;  %s27_s22 = sadd.s32 1, %s711_s17 }
   0x7   : > { %s24_s23 = ssub.s32 %s715_s18, %s771_s21  ;;  %p34_p0 = scmp.ne.s32.totalorder %s711_s17, %s707_s16 }
   0x8   : > { %p25_p1 = scmp.eq.s32.totalorder %s24_s23, 0  ;;  %p35_p2 = scmp.eq.s32.totalorder %s715_s18, 0 }
   0x9   : > { %p40_p3 = scmp.ne.s32.totalorder %s707_s16, %s703_s15  ;;  %p41_p4 = scmp.eq.s32.totalorder %s767_s19, 0 }
   0xa   : > { %s783_s24 = scalar_select %p25_p1, %s711_s17, %s27_s22  }
   0xb   : > { %p785_p5 = por %p35_p2, %p34_p0  ;;  %p789_p6 = por %p41_p4, %p40_p3 }
   0xc   : > { %p132_p7 = scmp.eq.s32.totalorder %s767_s19, 1  ;;  %p138_p8 = scmp.eq.s32.totalorder %s521_s20, 1 }
   0xd   : > { %p552_p10 = scmp.lt.s32.totalorder %s715_s18, 2  ;;  %s164_s29 = sand.u32 1, %s711_s17  }
   0xe   : > { %p796_p11 = por %p132_p7, %p34_p0  ;;  %p800_p12 = por %p138_p8, %p40_p3 }
   0xf   : > { %s525_s30 = sshll.u32 %s715_s18, 7  ;;  %s524_s5 = sshll.u32 %s164_s29, 3 }
  0x10   : > { %s976_s27 = scalar_select %p796_p11, 1, 0 }
  0x11   : > { %s977_s28 = scalar_select %p800_p12, 1, 0 }
  0x12   : > { %s809_s8 = scalar_lea.hbm %s968_s0, %s525_s30  ;;  %s168_s9 = scalar_lea.vmem [#allocation2], %s524_s5 }
  0x13   : > { %s175_s10 = sshll.u32 %s168_s9, 4  ;;  %p813_p13 = pnand %p552_p10, %p785_p5  ;;  %s817_s10 = int_to_ptr.vmem [resolvable:$true] %s175_s10 }
  0x14   : > { %s165_s12 = scalar_lea.sflag [#allocation3], %s164_s29  ;;  %s619_s13 = scalar_lea.hbm %s809_s8, 128 }
  0x15   : > { %p620_p2 = scmp.ne.s32.totalorder %s809_s8, %s619_s13  ;;  %p621_p3 = pneg %p813_p13 }
  0x16   : > { %s624_s22 = scalar_lea.hbm %s968_s0, 256  ;;  %p625_p5 = scmp.lt.u32.totalorder %s809_s8, %s968_s0 }
  0x17   : > { %p622_p4 = pnand %p621_p3, %p620_p2  ;;  %p626_p8 = scmp.lt.u32.totalorder %s624_s22, %s619_s13 }
  0x18   : > { %p628_p9 = scmp.lt.u32.totalorder %s619_s13, %s809_s8 }
  0x19   : > { %p623_p7 = pneg %p622_p4  ;;  %p627_p10 = por %p626_p8, %p625_p5 }
  0x1b   : > { %p629_p0 = por %p628_p9, %p627_p10 }
  0x1d   : > { %p630_p1 = pnand %p629_p0, %p623_p7 }
  0x1f   : > { %633 = shalt.err (!%p630_p1)
}
  0x20   : > { %s634_s29 = scalar_lea.vmem %s817_s10, 128  ;;  %s717_s30 = smov [#allocation2]  }
  0x21   : > { %p635_p2 = scmp.ne.s32.totalorder %s817_s10, %s634_s29  ;;  %s639_s5 = sshll.u32 %s717_s30, 4  ;;  %s640_s5 = int_to_ptr.vmem [resolvable:$false] %s639_s5 }
  0x22   : > { %s641_s6 = scalar_lea.vmem %s640_s5, 256  ;;  %p642_p11 = scmp.lt.s32.totalorder %s817_s10, %s640_s5 }
  0x23   : > { %p637_p4 = pnand %p635_p2, %p621_p3  ;;  %p643_p5 = scmp.lt.s32.totalorder %s641_s6, %s634_s29 }
  0x25   : > { %p638_p12 = pneg %p637_p4  ;;  %p644_p8 = por %p643_p5, %p642_p11 }
  0x27   : > { %p645_p9 = pnand %p644_p8, %p638_p12 }
  0x29   : > { %648 = shalt.err (!%p645_p9)
}
  0x2a   : > { %547 = dma.hbm_to_vmem [thread:$0]  (!%p813_p13), %s809_s8, 128, %s817_s10, %s165_s12  }
  0x2b   : > { %p979_p0 = scmp.lt.s32.totalorder %s715_s18, 3  ;;  %p980_p1 = scmp.ge.s32.totalorder %s715_s18, 1 }
  0x2d   : > { %p187_p3 = pnand %p980_p1, %p979_p0 }
  0x2e   : > { %s851_s7 = sand.u32 (!%p187_p3), 1, %s707_s16  }
  0x2f   : > { %190 = sbr.rel (%p187_p3) target bundleno = 1310 (0x51e), region = 36  ;;  %s527_s9 = sshll.u32 (!%p187_p3), %s851_s7, 3 }
  0x30   : > { %s193_s13 = scalar_lea.sflag (!%p187_p3), [#allocation3], %s851_s7  ;;  %s196_s11 = scalar_lea.vmem (!%p187_p3), [#allocation2], %s527_s9 }
  0x36   : > { %694 = dma.done.wait (%p789_p6), %s193_s13, 128  }
  0x37   : > { %696 = vsyncadd (%p789_p6), %s193_s13, 4294967168  ;;  %v864_v0 = vld [vmem:[%s971_s3] ss:$0 sm:$0xff]  ;;  %vm238_vm0 = vcmask 130048   ;;  %v718_v4 = vmov 1   ;;  %v719_v5 = vmov 0  }
  0x38   : > { %v866_v1 = vld [vmem:[%s196_s11] sm:$0xff]  ;;  %589 = vset.pattern.permute.xlu1 %v718_v4  ;;  %588 = vset.pattern.permute.xlu0 %v719_v5  ;;  %p224_p6 = scmp.lt.s32.totalorder %s767_s19, 1  ;;  %s537_s30 = sshll.u32 %s767_s19, 7 }
  0x39   : > { %v237_v2 = vmul.f32 %v864_v0, %v866_v1  ;;  %v230_v10 = vld [vmem:[%s970_s2] sm:$0xff]  ;;  %v248_v13 = vsel %vm238_vm0, %v866_v1, 0.0  ;;  %s223_s5 = scalar_lea.vmem [#allocation5], %s527_s9  ;;  %s923_s8 = scalar_lea.hbm %s972_s4, %s537_s30 }
  0x3a   : > { %v249_v14 = vrot.slane %v248_v13, 4  ;;  %s225_s14 = scalar_select %p224_p6, %s767_s19, 1 }
  0x3b   : > { %v239_v3 = vsel %vm238_vm0, %v237_v2, 0.0  ;;  %s442_s6 = sshll.u32 %s223_s5, 4  ;;  %s429_s19 = scalar_lea.sflag [#allocation4], %s851_s7  ;;  %s925_s6 = int_to_ptr.vmem [resolvable:$true] %s442_s6 }
  0x3c   : > { %240 = vadd.xlane.f32.xlu0 %v239_v3  ;;  %v250_v15 = vadd.f32 %v249_v14, %v248_v13  ;;  %s226_s23 = scalar_lea.vmem %s969_s1, %s225_s14  ;;  %s649_s10 = scalar_lea.vmem %s925_s6, 128 }
  0x3d   : > { %v885_v37 = vld [vmem:[%s226_s23] ss:$0 sm:$0xff]  ;;  %p650_p11 = scmp.ne.s32.totalorder %s925_s6, %s649_s10  ;;  %p981_p12 = scmp.ne.s32.totalorder %s976_s27, 0 }
  0x3e   : > { %v251_v16 = vrot.slane %v250_v15, 2  ;;  %s720_s9 = smov [#allocation5]  }
  0x3f   : > { %p651_p13 = pnand %p650_p11, %p981_p12  ;;  %s653_s26 = sshll.u32 %s720_s9, 4  ;;  %s654_s26 = int_to_ptr.vmem [resolvable:$false] %s653_s26 }
  0x40   : > { %v252_v17 = vadd.f32 %v251_v16, %v250_v15  ;;  %s655_s12 = scalar_lea.vmem %s654_s26, 256  ;;  %p656_p10 = scmp.lt.s32.totalorder %s925_s6, %s654_s26 }
  0x41   : > { %p652_p7 = pneg %p651_p13  ;;  %p657_p2 = scmp.lt.s32.totalorder %s655_s12, %s649_s10 }
  0x42   : > { %v253_v18 = vrot.slane %v252_v17, 1 }
  0x43   : > { %p658_p4 = por %p657_p2, %p656_p10 }
  0x44   : > { %v254_v19 = vadd.f32 %v253_v18, %v252_v17 }
  0x45   : > { %p659_p5 = pnand %p658_p4, %p652_p7 }
  0x46   : > { %v256_v20 = vmul.f32 0.125, %v254_v19 }
  0x48   : > { %v257_v21 = vsub.f32 %v866_v1, %v256_v20 }
  0x4a   : > { %v258_v22 = vmul.f32 %v257_v21, %v257_v21 }
  0x4c   : > { %v259_v23 = vsel %vm238_vm0, %v258_v22, 0.0 }
  0x4d   : > { %v260_v24 = vrot.slane %v259_v23, 4 }
  0x4f   : > { %v261_v25 = vadd.f32 %v260_v24, %v259_v23 }
  0x51   : > { %v262_v26 = vrot.slane %v261_v25, 2 }
  0x53   : > { %v263_v27 = vadd.f32 %v262_v26, %v261_v25 }
  0x55   : > { %v264_v28 = vrot.slane %v263_v27, 1 }
  0x57   : > { %v265_v29 = vadd.f32 %v264_v28, %v263_v27 }
  0x59   : > { %v266_v30 = vmul.f32 0.125, %v265_v29 }
  0x5b   : > { %v267_v31 = vadd.f32 1e-05, %v266_v30 }
  0xc9   : > { %v241_v6 = vpop.xlane.xlu0 %240 }
  0xca   : > { %v530_v7 = vmul.f32 -1.442695, %v241_v6 }
  0xcc   : > { %595 = vpow2.f32 %v530_v7 }
  0xd6   : > { %v596_v8 = vpop.eup %595 }
  0xd7   : > { %v245_v9 = vadd.f32 1.0, %v596_v8 }
  0xd9   : > { %597 = vrcp.f32 %v245_v9 }
  0xda   : > { %599 = vrsqrt.f32 %v267_v31 }
  0xe3   : > { %v598_v11 = vpop.eup %597 }
  0xe4   : > { %v269_v12 = vmul.f32 %v598_v11, %v230_v10  ;;  %v600_v32 = vpop.eup %599 }
  0xe5   : > { %v270_v33 = vmul.f32 %v600_v32, %v257_v21  ;;  %v533_v21 = vld [vmem:[%s970_s2 + $0x8] sm:$0xff] }
  0xe6   : > { %278 = vperm.xlu1 %589, %v269_v12   ;;  %273 = vperm.xlu0 %588, %v269_v12  }
  0xea   : > { %590 = vset.pattern.permute.xlu1 %v719_v5  ;;  %591 = vset.pattern.permute.xlu0 %v718_v4 }
 0x165   : > { %v274_v34 = vpop.permute.xlu0 %273  ;;  %v279_v36 = vpop.permute.xlu1 %278 }
 0x166   : > { %v276_v35 = vmul.f32 %v274_v34, %v270_v33 }
 0x168   : > { %v281_v38 = vadd.f32 %v279_v36, %v276_v35 }
 0x16a   : > { %v288_v39 = vmul.f32 %v885_v37, %v281_v38 }
 0x16c   : > { %v289_v40 = vadd.f32 %v288_v39, %v866_v1 }
 0x16e   : > { %v290_v41 = vmul.f32 %v864_v0, %v289_v40  ;;  %v300_v49 = vsel %vm238_vm0, %v289_v40, 0.0 }
 0x16f   : > { %v301_v50 = vrot.slane %v300_v49, 4 }
 0x170   : > { %v291_v42 = vsel %vm238_vm0, %v290_v41, 0.0 }
 0x171   : > { %292 = vadd.xlane.f32.xlu1 %v291_v42  ;;  %v302_v51 = vadd.f32 %v301_v50, %v300_v49 }
 0x173   : > { %v303_v52 = vrot.slane %v302_v51, 2 }
 0x175   : > { %v304_v53 = vadd.f32 %v303_v52, %v302_v51 }
 0x177   : > { %v305_v54 = vrot.slane %v304_v53, 1 }
 0x179   : > { %v306_v55 = vadd.f32 %v305_v54, %v304_v53 }
 0x17b   : > { %v307_v56 = vmul.f32 0.125, %v306_v55 }
 0x17d   : > { %v308_v57 = vsub.f32 %v289_v40, %v307_v56 }
 0x17f   : > { %v309_v58 = vmul.f32 %v308_v57, %v308_v57 }
 0x181   : > { %v310_v59 = vsel %vm238_vm0, %v309_v58, 0.0 }
 0x182   : > { %v311_v60 = vrot.slane %v310_v59, 4 }
 0x184   : > { %v312_v61 = vadd.f32 %v311_v60, %v310_v59 }
 0x186   : > { %v313_v62 = vrot.slane %v312_v61, 2 }
 0x188   : > { %v314_v63 = vadd.f32 %v313_v62, %v312_v61 }
 0x18a   : > { %v315_v2 = vrot.slane %v314_v63, 1 }
 0x18c   : > { %v316_v3 = vadd.f32 %v315_v2, %v314_v63 }
 0x1fe   : > { %v293_v43 = vpop.xlane.xlu1 %292 }
 0x1ff   : > { %v532_v44 = vmul.f32 -1.442695, %v293_v43 }
 0x201   : > { %601 = vpow2.f32 %v532_v44 }
 0x20b   : > { %v602_v45 = vpop.eup %601 }
 0x20c   : > { %v297_v46 = vadd.f32 1.0, %v602_v45 }
 0x20e   : > { %603 = vrcp.f32 %v297_v46 }
 0x218   : > { %v604_v47 = vpop.eup %603 }
 0x219   : > { %v320_v48 = vmul.f32 %v604_v47, %v230_v10 }
 0x21b   : > { %329 = vperm.xlu0 %591, %v320_v48   ;;  %324 = vperm.xlu1 %590, %v320_v48  }
 0x21f   : > { %593 = vset.pattern.permute.xlu0 %v719_v5  ;;  %v317_v5 = vmul.f32 0.125, %v316_v3 }
 0x221   : > { %v318_v6 = vadd.f32 1e-05, %v317_v5 }
 0x223   : > { %605 = vrsqrt.f32 %v318_v6 }
 0x22d   : > { %v606_v7 = vpop.eup %605 }
 0x22e   : > { %v321_v8 = vmul.f32 %v606_v7, %v308_v57 }
 0x29a   : > { %v325_v9 = vpop.permute.xlu1 %324  ;;  %v330_v11 = vpop.permute.xlu0 %329 }
 0x29b   : > { %v327_v10 = vmul.f32 %v325_v9, %v321_v8 }
 0x29d   : > { %v332_v12 = vadd.f32 %v330_v11, %v327_v10 }
 0x29f   : > { %v333_v13 = vmul.f32 %v885_v37, %v332_v12 }
 0x2a1   : > { %v895_v14 = vadd.f32 %v333_v13, %v866_v1 }
 0x2a3   : > { %v337_v15 = vmul.f32 %v864_v0, %v895_v14  ;;  %v347_v1 = vsel %vm238_vm0, %v895_v14, 0.0 }
 0x2a4   : > { %v348_v24 = vrot.slane %v347_v1, 4 }
 0x2a5   : > { %v338_v16 = vsel %vm238_vm0, %v337_v15, 0.0 }
 0x2a6   : > { %339 = vadd.xlane.f32.xlu0 %v338_v16  ;;  %v349_v25 = vadd.f32 %v348_v24, %v347_v1 }
 0x2a8   : > { %v350_v26 = vrot.slane %v349_v25, 2 }
 0x2aa   : > { %v351_v27 = vadd.f32 %v350_v26, %v349_v25 }
 0x2ac   : > { %v352_v28 = vrot.slane %v351_v27, 1 }
 0x2ae   : > { %v353_v29 = vadd.f32 %v352_v28, %v351_v27 }
 0x2b0   : > { %v354_v30 = vmul.f32 0.125, %v353_v29 }
 0x2b2   : > { %v355_v31 = vsub.f32 %v895_v14, %v354_v30 }
 0x2b4   : > { %v356_v32 = vmul.f32 %v355_v31, %v355_v31 }
 0x2b6   : > { %v357_v33 = vsel %vm238_vm0, %v356_v32, 0.0 }
 0x2b7   : > { %v358_v34 = vrot.slane %v357_v33, 4 }
 0x2b9   : > { %v359_v35 = vadd.f32 %v358_v34, %v357_v33 }
 0x2bb   : > { %v360_v36 = vrot.slane %v359_v35, 2 }
 0x2bd   : > { %v361_v38 = vadd.f32 %v360_v36, %v359_v35 }
 0x2bf   : > { %v362_v39 = vrot.slane %v361_v38, 1 }
 0x2c1   : > { %v363_v40 = vadd.f32 %v362_v39, %v361_v38 }
 0x2c3   : > { %v364_v41 = vmul.f32 0.125, %v363_v40 }
 0x2c5   : > { %v365_v42 = vadd.f32 1e-05, %v364_v41 }
 0x333   : > { %v340_v17 = vpop.xlane.xlu0 %339 }
 0x334   : > { %v534_v18 = vmul.f32 -1.442695, %v340_v17 }
 0x336   : > { %607 = vpow2.f32 %v534_v18 }
 0x340   : > { %v608_v19 = vpop.eup %607 }
 0x341   : > { %v344_v20 = vadd.f32 1.0, %v608_v19 }
 0x343   : > { %609 = vrcp.f32 %v344_v20 }
 0x344   : > { %611 = vrsqrt.f32 %v365_v42 }
 0x34d   : > { %v610_v22 = vpop.eup %609 }
 0x34e   : > { %v367_v23 = vmul.f32 %v610_v22, %v533_v21  ;;  %v612_v43 = vpop.eup %611 }
 0x34f   : > { %v368_v45 = vmul.f32 %v612_v43, %v355_v31 }
 0x350   : > { %371 = vperm.xlu1 %590, %v367_v23  }
 0x354   : > { %592 = vset.pattern.permute.xlu1 %v718_v4 }
 0x355   : > { %376 = vperm.xlu1 %592, %v367_v23  }
 0x3cf   : > { %v372_v44 = vpop.permute.xlu1 %371 }
 0x3d0   : > { %v374_v46 = vmul.f32 %v372_v44, %v368_v45 }
 0x3d4   : > { %v377_v47 = vpop.permute.xlu1 %376 }
 0x3d5   : > { %v379_v48 = vadd.f32 %v377_v47, %v374_v46 }
 0x3d7   : > { %v380_v49 = vmul.f32 %v885_v37, %v379_v48 }
 0x3d9   : > { %v381_v50 = vadd.f32 %v380_v49, %v895_v14 }
 0x3db   : > { %v382_v51 = vmul.f32 %v864_v0, %v381_v50  ;;  %v392_v59 = vsel %vm238_vm0, %v381_v50, 0.0 }
 0x3dc   : > { %v393_v60 = vrot.slane %v392_v59, 4 }
 0x3dd   : > { %v383_v52 = vsel %vm238_vm0, %v382_v51, 0.0 }
 0x3de   : > { %384 = vadd.xlane.f32.xlu1 %v383_v52  ;;  %v394_v61 = vadd.f32 %v393_v60, %v392_v59 }
 0x3e0   : > { %v395_v0 = vrot.slane %v394_v61, 2 }
 0x3e2   : > { %v396_v62 = vadd.f32 %v395_v0, %v394_v61 }
 0x3e4   : > { %v397_v63 = vrot.slane %v396_v62, 1 }
 0x3e6   : > { %v398_v2 = vadd.f32 %v397_v63, %v396_v62 }
 0x3e8   : > { %v399_v3 = vmul.f32 0.125, %v398_v2 }
 0x3ea   : > { %v400_v5 = vsub.f32 %v381_v50, %v399_v3 }
 0x3ec   : > { %v401_v6 = vmul.f32 %v400_v5, %v400_v5 }
 0x3ee   : > { %v402_v7 = vsel %vm238_vm0, %v401_v6, 0.0 }
 0x3ef   : > { %v403_v8 = vrot.slane %v402_v7, 4 }
 0x3f1   : > { %v404_v9 = vadd.f32 %v403_v8, %v402_v7 }
 0x3f3   : > { %v405_v10 = vrot.slane %v404_v9, 2 }
 0x3f5   : > { %v406_v11 = vadd.f32 %v405_v10, %v404_v9 }
 0x46b   : > { %v385_v53 = vpop.xlane.xlu1 %384 }
 0x46c   : > { %v535_v54 = vmul.f32 -1.442695, %v385_v53 }
 0x46e   : > { %613 = vpow2.f32 %v535_v54 }
 0x478   : > { %v614_v55 = vpop.eup %613 }
 0x479   : > { %v389_v56 = vadd.f32 1.0, %v614_v55 }
 0x47b   : > { %615 = vrcp.f32 %v389_v56 }
 0x485   : > { %v616_v57 = vpop.eup %615 }
 0x486   : > { %v412_v58 = vmul.f32 %v616_v57, %v533_v21 }
 0x488   : > { %421 = vperm.xlu1 %592, %v412_v58   ;;  %416 = vperm.xlu0 %593, %v412_v58  }
 0x48c   : > { %594 = vset.pattern.permute.xlu0 %v718_v4  ;;  %v407_v4 = vrot.slane %v406_v11, 1 }
 0x48e   : > { %v408_v12 = vadd.f32 %v407_v4, %v406_v11 }
 0x490   : > { %v409_v13 = vmul.f32 0.125, %v408_v12 }
 0x492   : > { %v410_v15 = vadd.f32 1e-05, %v409_v13 }
 0x494   : > { %617 = vrsqrt.f32 %v410_v15 }
 0x49e   : > { %v618_v16 = vpop.eup %617 }
 0x49f   : > { %v413_v17 = vmul.f32 %v618_v16, %v400_v5 }
 0x507   : > { %v417_v18 = vpop.permute.xlu0 %416  ;;  %v422_v20 = vpop.permute.xlu1 %421 }
 0x508   : > { %v419_v19 = vmul.f32 %v417_v18, %v413_v17 }
 0x50a   : > { %v424_v21 = vadd.f32 %v422_v20, %v419_v19 }
 0x50c   : > { %v425_v22 = vmul.f32 %v885_v37, %v424_v21 }
 0x50e   : > { %v426_v23 = vadd.f32 %v425_v22, %v895_v14 }
 0x510   : > { %427 = vst.msk [vmem:[%s223_s5] sm:$0xff] %vm238_vm0, %v426_v23 }
 0x511   : > { %662 = shalt.err (!%p659_p5)
}
 0x512   : > { %s663_s7 = scalar_lea.hbm %s923_s8, 128  ;;  %s667_s22 = scalar_lea.hbm %s972_s4, 256 }
 0x513   : > { %p664_p8 = scmp.ne.s32.totalorder %s923_s8, %s663_s7  ;;  %p668_p1 = scmp.lt.u32.totalorder %s923_s8, %s972_s4 }
 0x514   : > { %p669_p3 = scmp.lt.u32.totalorder %s667_s22, %s663_s7  ;;  %p671_p11 = scmp.lt.u32.totalorder %s663_s7, %s923_s8 }
 0x515   : > { %p665_p9 = pnand %p664_p8, %p981_p12 }
 0x516   : > { %p670_p6 = por %p669_p3, %p668_p1 }
 0x517   : > { %p666_p0 = pneg %p665_p9 }
 0x518   : > { %p672_p13 = por %p671_p11, %p670_p6 }
 0x51a   : > { %p673_p7 = pnand %p672_p13, %p666_p0 }
 0x51c   : > { %676 = shalt.err (!%p673_p7)
}
 0x51d   : > { %542 = dma.vmem_to_hbm [thread:$0]  (%p981_p12), %s925_s6, 128, %s923_s8, %s429_s19  }
 0x51e PF: > { %s454_s29 = sand.u32 1, %s703_s15   ;;  %p982_p10 = scmp.ne.s32.totalorder %s977_s28, 0 }
 0x51f   : > { %p983_p2 = scmp.ge.s32.totalorder %s715_s18, 2  ;;  %s455_s30 = scalar_lea.sflag [#allocation4], %s454_s29 }
 0x521   : > { %p549_p4 = pnand %p983_p2, %p982_p10 }
 0x523   : > { %698 = dma.done.wait (!%p549_p4), %s455_s30, 128  }
 0x524   : > { %700 = vsyncadd (!%p549_p4), %s455_s30, 4294967168  ;;  %p17_p5 = scmp.ge.s32.totalorder %s771_s21, 4   ;;  %s984_s15 = smov %s707_s16 }
 0x525   : > { %s985_s16 = smov %s711_s17  ;;  %s986_s17 = smov %s783_s24 }
 0x526   : > { %s987_s18 = smov %s771_s21  ;;  %19 = sbr.rel (!%p17_p5) target bundleno = 5 (0x5), region = 85 }
 0x52d   :  { %460 = vsyncpa [#allocation3], 1 }
 0x52e   :  { %462 = vsyncpa [#allocation3 + $0x1], 1 }
 0x52f   :  { %463 = vsyncpa [#allocation4], 1 }
 0x530   :  { %465 = vsyncpa [#allocation4 + $0x1], 1 }

</bundles_post_ra>
